<compile_context>
chip_gen: v7x
topology: tpu7x:2x2x1
jax: 0.10.0
libtpu: 0.0.40
codegen_flags: <defaults>
</compile_context>

<pallas_src>
from functools import partial

import numpy as np
import jax
import jax.numpy as jnp
from jax.experimental import pallas as pl
from jax.experimental.pallas import tpu as pltpu

EPS = 1e-5


# ----------------------------- Pallas kernel ------------------------------ #
def _net_kernel(x_ref, w1_ref, sh1_ref, w2_ref, sh2_ref, w3_ref, out_ref):
    x = x_ref[...].astype(jnp.bfloat16)                              # (8, bn)

    # conv1 (+ folded BN scale): (128, 8) @ (8, bn) -> (128, bn) f32.
    # Rows 0..63 = even output positions, 64..127 = odd (pos-major, ch-minor).
    y = jnp.dot(w1_ref[...], x, preferred_element_type=jnp.float32)
    y = jnp.maximum(y[:64, :], y[64:, :])                            # MaxPool1d(2,2)
    y = jnp.maximum(y + sh1_ref[...], 0.0)                           # BN shift + ReLU

    # conv2 (+ folded BN scale): (256, 64) @ (64, bn) -> (256, bn) f32.
    z = jnp.dot(w2_ref[...], y.astype(jnp.bfloat16),
                preferred_element_type=jnp.float32)
    z = jnp.maximum(z[:128, :], z[128:, :])                          # MaxPool1d(2,2)
    z = jnp.maximum(z + sh2_ref[...], 0.0)                           # BN shift + ReLU

    # Linear(128 -> 1): lane-dense (1, bn) output row; bias added on the host.
    out_ref[...] = jnp.dot(w3_ref[...], z.astype(jnp.bfloat16),
                           preferred_element_type=jnp.float32)


# ----------------------- parameter / operand set-up ----------------------- #
def _conv_toeplitz(W, L_in, L_out, phase):
    """Toeplitz matrix for Conv1d(kernel=3, stride=1, pad=1) followed by taking
    output positions l = 2*p + phase (p in [0, L_out)).
    W: (C_out, C_in, 3).  Returns (L_in*C_in, L_out*C_out), pos-major/chan-minor."""
    C_out, C_in, K = W.shape
    A = np.zeros((L_in, C_in, L_out, C_out), np.float32)
    for p in range(L_out):
        l = 2 * p + phase
        for k in range(K):
            i = l + k - 1
            if 0 <= i < L_in:
                A[i, :, p, :] = W[:, :, k].T
    return A.reshape(L_in * C_in, L_out * C_out)


def init_params(key):
    ks = jax.random.split(key, 14)
    u = lambda k, shape, s: ((jax.random.uniform(k, shape, jnp.float32) * 2 - 1) * s)
    W1 = u(ks[0], (16, 1, 3), 1.0 / np.sqrt(3.0))
    b1 = u(ks[1], (16,), 1.0 / np.sqrt(3.0))
    g1 = 1.0 + 0.2 * u(ks[2], (16,), 1.0)
    be1 = 0.1 * u(ks[3], (16,), 1.0)
    rm1 = 0.1 * u(ks[4], (16,), 1.0)
    rv1 = 1.0 + 0.5 * jax.random.uniform(ks[5], (16,), jnp.float32)
    W2 = u(ks[6], (64, 16, 3), 1.0 / np.sqrt(48.0))
    b2 = u(ks[7], (64,), 1.0 / np.sqrt(48.0))
    g2 = 1.0 + 0.2 * u(ks[8], (64,), 1.0)
    be2 = 0.1 * u(ks[9], (64,), 1.0)
    rm2 = 0.1 * u(ks[10], (64,), 1.0)
    rv2 = 1.0 + 0.5 * jax.random.uniform(ks[11], (64,), jnp.float32)
    W3 = u(ks[12], (1, 128), 1.0 / np.sqrt(128.0))
    b3 = u(ks[13], (1,), 1.0 / np.sqrt(128.0))
    return [W1, b1, g1, be1, rm1, rv1, W2, b2, g2, be2, rm2, rv2, W3, b3]


def pack_kernel_operands(params):
    """One-time host-side packing: Toeplitz construction, even|odd phase
    concatenation, BN scale folding, transposition to the batch-on-lanes
    layout, bf16 cast of the MXU operands, Linear weight reorder."""
    (W1, b1, g1, be1, rm1, rv1,
     W2, b2, g2, be2, rm2, rv2, W3, b3) = [np.asarray(p, np.float32) for p in params]

    s1 = g1 / np.sqrt(rv1 + EPS)
    t1 = (b1 - rm1) * s1 + be1
    s2 = g2 / np.sqrt(rv2 + EPS)
    t2 = (b2 - rm2) * s2 + be2

    # conv1: rows = [even(4 pos x 16 ch) | odd(4 pos x 16 ch)] -> (128, 8).
    A1 = np.concatenate([_conv_toeplitz(W1, 8, 4, 0),
                         _conv_toeplitz(W1, 8, 4, 1)], axis=1)       # (8, 128)
    W1T = (A1 * np.tile(s1, 8)[None, :]).T                           # (128, 8)
    sh1 = np.tile(t1, 4)[:, None]                                    # (64, 1)

    # conv2: rows = [even(2 pos x 64 ch) | odd(2 pos x 64 ch)] -> (256, 64);
    # input rows are the compact pooled (4 pos x 16 ch) activation.
    A2 = np.concatenate([_conv_toeplitz(W2, 4, 2, 0),
                         _conv_toeplitz(W2, 4, 2, 1)], axis=1)       # (64, 256)
    W2T = (A2 * np.tile(s2, 4)[None, :]).T                           # (256, 64)
    sh2 = np.tile(t2, 2)[:, None]                                    # (128, 1)

    # PyTorch reshape(-1, 64*2) flattens (N, 64, 2) channel-major (c*2 + p);
    # the kernel's z is position-major (p*64 + c), so reorder W3 instead.
    w3t = W3.reshape(64, 2).T.reshape(1, 128)                        # (1, 128)

    ops = (jnp.asarray(W1T, jnp.bfloat16),
           jnp.asarray(sh1, jnp.float32),
           jnp.asarray(W2T, jnp.bfloat16),
           jnp.asarray(sh2, jnp.float32),
           jnp.asarray(w3t, jnp.bfloat16))
    return ops, jnp.asarray(b3, jnp.float32)


# ------------------------------- wrapper ----------------------------------- #
def _round_up(n, m):
    return (n + m - 1) // m * m


@partial(jax.jit, static_argnames=("bn_tile",))
def _net_forward_jit(x_ncl, ops, b3, *, bn_tile):
    N = x_ncl.shape[0]
    x2 = x_ncl.reshape(N, 8).astype(jnp.float32)

    # Adaptive batch tile: big tiles (default 4096 lanes) so per-step work
    # dwarfs the ~0.35us pipeline overhead, shrunk to a multiple of 128 for
    # small batches.  Keep at least 2 grid steps when the batch allows it so
    # the "parallel" grid axis can shard across both v7x TensorCores (the extra
    # step is noise on 1-TC v5e/v6e).
    bn = min(_round_up(bn_tile, 128), _round_up(N, 128))
    Np = _round_up(N, bn)
    if Np // bn < 2 and Np >= 256:
        bn = _round_up(Np // 2, 128)
        Np = _round_up(N, bn)
    if Np != N:
        x2 = jnp.pad(x2, ((0, Np - N), (0, 0)))
    xT = x2.T                                  # (8, Np): lane-dense, batch on lanes
    n_tiles = Np // bn

    w_specs = [pl.BlockSpec(op.shape, lambda i: (0, 0)) for op in ops]

    out = pl.pallas_call(
        _net_kernel,
        out_shape=jax.ShapeDtypeStruct((1, Np), jnp.float32),
        grid_spec=pltpu.PrefetchScalarGridSpec(
            num_scalar_prefetch=0,
            grid=(n_tiles,),
            in_specs=[pl.BlockSpec((8, bn), lambda i: (0, i))] + w_specs,
            # lane-dense output block: last dim = bn (multiple of 128)
            out_specs=pl.BlockSpec((1, bn), lambda i: (0, i)),
        ),
        compiler_params=pltpu.CompilerParams(
            dimension_semantics=("parallel",)),
    )(xT, *ops)

    return out[0, :N].reshape(N, 1) + b3.reshape(1, 1)


def make_net_forward(params, *, bn_tile=4096):
    """Pack weights once (host-side), return a jitted forward fn of x (N,1,8)."""
    ops, b3 = pack_kernel_operands(params)

    def forward(x_ncl):
        assert x_ncl.shape[1:] == (1, 8), "Net.forward requires input (N, 1, 8)"
        return _net_forward_jit(x_ncl, ops, b3, bn_tile=bn_tile)

    return forward


# ------------------------- pure NumPy reference ---------------------------- #
def ref_forward(x, params):
    (W1, b1, g1, be1, rm1, rv1,
     W2, b2, g2, be2, rm2, rv2, W3, b3) = [np.asarray(p, np.float32) for p in params]

    def conv1d_p1(x, W, b):
        N, C, L = x.shape
        xp = np.pad(x, ((0, 0), (0, 0), (1, 1)))
        y = np.zeros((N, W.shape[0], L), np.float32)
        for k in range(3):
            y += np.einsum('ncl,oc->nol', xp[:, :, k:k + L], W[:, :, k])
        return y + b[None, :, None]

    def bn(y, g, be, rm, rv):
        return ((y - rm[None, :, None]) / np.sqrt(rv + EPS)[None, :, None]
                * g[None, :, None] + be[None, :, None])

    y = np.maximum(bn(conv1d_p1(x, W1, b1), g1, be1, rm1, rv1), 0.0)
    y = np.maximum(y[:, :, 0::2], y[:, :, 1::2])
    y = np.maximum(bn(conv1d_p1(y, W2, b2), g2, be2, rm2, rv2), 0.0)
    y = np.maximum(y[:, :, 0::2], y[:, :, 1::2])
    y = y.reshape(x.shape[0], 128)
    return y @ W3.T + b3[None, :]


# --------------------------------- main ------------------------------------ #
if __name__ == "__main__":
    key = jax.random.PRNGKey(0)
    kx, kp = jax.random.split(key)

    N = 16
    x = jax.random.normal(kx, (N, 1, 8), jnp.float32)   # PyTorch NCL input
    params = init_params(kp)

    forward = make_net_forward(params)                  # pack weights once + jit
    y = jax.block_until_ready(forward(x))

    y_ref = ref_forward(np.asarray(x), params)
    assert y.shape == (N, 1)
    # bf16 MXU operands (f32 accumulation) -> loosened tolerance vs f32 reference.
    np.testing.assert_allclose(np.asarray(y), y_ref, rtol=2e-2, atol=5e-2)
    print("KERNEL_OK")
</pallas_src>

<mosaic_0001>
module attributes {stable_mosaic.version = 11 : i64} {
  func.func @_net_kernel(%arg0: i32, %arg1: memref<8x128xf32, #tpu.memory_space<vmem>>, %arg2: memref<128x8xbf16, #tpu.memory_space<vmem>>, %arg3: memref<64x1xf32, #tpu.memory_space<vmem>>, %arg4: memref<256x64xbf16, #tpu.memory_space<vmem>>, %arg5: memref<128x1xf32, #tpu.memory_space<vmem>>, %arg6: memref<1x128xbf16, #tpu.memory_space<vmem>>, %arg7: memref<1x128xf32, #tpu.memory_space<vmem>>) attributes {dimension_semantics = [#tpu.dimension_semantics<parallel>], iteration_bounds = array<i64: 1>, scalar_prefetch = 0 : i64, scratch_operands = 0 : i64, tpu.core_type = #tpu.core_type<tc>, window_params = [{transform_indices = @transform_0, window_bounds = array<i64: 8, 128>}, {pipeline_mode = #tpu.pipeline_mode<synchronous>, transform_indices = @transform_1, window_bounds = array<i64: 128, 8>}, {pipeline_mode = #tpu.pipeline_mode<synchronous>, transform_indices = @transform_2, window_bounds = array<i64: 64, 1>}, {pipeline_mode = #tpu.pipeline_mode<synchronous>, transform_indices = @transform_3, window_bounds = array<i64: 256, 64>}, {pipeline_mode = #tpu.pipeline_mode<synchronous>, transform_indices = @transform_4, window_bounds = array<i64: 128, 1>}, {pipeline_mode = #tpu.pipeline_mode<synchronous>, transform_indices = @transform_5, window_bounds = array<i64: 1, 128>}, {transform_indices = @transform_6, window_bounds = array<i64: 1, 128>}]} {
    %c0 = arith.constant 0 : index
    %c0_0 = arith.constant 0 : index
    %0 = vector.load %arg1[%c0, %c0_0] : memref<8x128xf32, #tpu.memory_space<vmem>>, vector<8x128xf32>
    %1 = arith.truncf %0 : vector<8x128xf32> to vector<8x128xbf16>
    %c0_1 = arith.constant 0 : index
    %c0_2 = arith.constant 0 : index
    %2 = vector.load %arg2[%c0_1, %c0_2] : memref<128x8xbf16, #tpu.memory_space<vmem>>, vector<128x8xbf16>
    %cst = arith.constant dense<0.000000e+00> : vector<128x128xf32>
    %3 = tpu.matmul %2, %1, %cst {dimension_numbers = #tpu.dot_dimension_numbers<[1], [0], [0], [1], [0, 0, 1, 1], [], []>} : vector<128x8xbf16>, vector<8x128xbf16>, vector<128x128xf32> -> vector<128x128xf32>
    %4 = vector.extract_strided_slice %3 {offsets = [0, 0], sizes = [64, 128], strides = [1, 1]} : vector<128x128xf32> to vector<64x128xf32>
    %5 = vector.extract_strided_slice %3 {offsets = [64, 0], sizes = [64, 128], strides = [1, 1]} : vector<128x128xf32> to vector<64x128xf32>
    %6 = arith.maximumf %4, %5 : vector<64x128xf32>
    %c0_3 = arith.constant 0 : index
    %c0_4 = arith.constant 0 : index
    %7 = vector.load %arg3[%c0_3, %c0_4] : memref<64x1xf32, #tpu.memory_space<vmem>>, vector<64x1xf32>
    %8 = vector.broadcast %7 : vector<64x1xf32> to vector<64x128xf32>
    %9 = arith.addf %6, %8 : vector<64x128xf32>
    %cst_5 = arith.constant 0.000000e+00 : f32
    %10 = vector.broadcast %cst_5 : f32 to vector<64x128xf32>
    %11 = arith.maximumf %9, %10 : vector<64x128xf32>
    %c0_6 = arith.constant 0 : index
    %c0_7 = arith.constant 0 : index
    %12 = vector.load %arg4[%c0_6, %c0_7] : memref<256x64xbf16, #tpu.memory_space<vmem>>, vector<256x64xbf16>
    %13 = arith.truncf %11 : vector<64x128xf32> to vector<64x128xbf16>
    %cst_8 = arith.constant dense<0.000000e+00> : vector<256x128xf32>
    %14 = tpu.matmul %12, %13, %cst_8 {dimension_numbers = #tpu.dot_dimension_numbers<[1], [0], [0], [1], [0, 0, 1, 1], [], []>} : vector<256x64xbf16>, vector<64x128xbf16>, vector<256x128xf32> -> vector<256x128xf32>
    %15 = vector.extract_strided_slice %14 {offsets = [0, 0], sizes = [128, 128], strides = [1, 1]} : vector<256x128xf32> to vector<128x128xf32>
    %16 = vector.extract_strided_slice %14 {offsets = [128, 0], sizes = [128, 128], strides = [1, 1]} : vector<256x128xf32> to vector<128x128xf32>
    %17 = arith.maximumf %15, %16 : vector<128x128xf32>
    %c0_9 = arith.constant 0 : index
    %c0_10 = arith.constant 0 : index
    %18 = vector.load %arg5[%c0_9, %c0_10] : memref<128x1xf32, #tpu.memory_space<vmem>>, vector<128x1xf32>
    %19 = vector.broadcast %18 : vector<128x1xf32> to vector<128x128xf32>
    %20 = arith.addf %17, %19 : vector<128x128xf32>
    %cst_11 = arith.constant 0.000000e+00 : f32
    %21 = vector.broadcast %cst_11 : f32 to vector<128x128xf32>
    %22 = arith.maximumf %20, %21 : vector<128x128xf32>
    %c0_12 = arith.constant 0 : index
    %c0_13 = arith.constant 0 : index
    %23 = vector.load %arg6[%c0_12, %c0_13] : memref<1x128xbf16, #tpu.memory_space<vmem>>, vector<1x128xbf16>
    %24 = arith.truncf %22 : vector<128x128xf32> to vector<128x128xbf16>
    %cst_14 = arith.constant dense<0.000000e+00> : vector<1x128xf32>
    %25 = tpu.matmul %23, %24, %cst_14 {dimension_numbers = #tpu.dot_dimension_numbers<[1], [0], [0], [1], [0, 0, 1, 1], [], []>} : vector<1x128xbf16>, vector<128x128xbf16>, vector<1x128xf32> -> vector<1x128xf32>
    %c0_15 = arith.constant 0 : index
    %c0_16 = arith.constant 0 : index
    %26 = vector.load %arg7[%c0_15, %c0_16] : memref<1x128xf32, #tpu.memory_space<vmem>>, vector<1x128xf32>
    tpu.vector_store %arg7[%c0_15, %c0_16], %25 {strides = array<i32>} : memref<1x128xf32, #tpu.memory_space<vmem>>, vector<1x128xf32>,
    return
  }
  func.func @transform_0(%arg0: i32) -> (i32, i32) {
    %c0_i32 = arith.constant 0 : i32
    %c0_i32_0 = arith.constant 0 : i32
    return %c0_i32, %arg0 : i32, i32
  }
  func.func @transform_1(%arg0: i32) -> (i32, i32) {
    %c0_i32 = arith.constant 0 : i32
    %c0_i32_0 = arith.constant 0 : i32
    %c0_i32_1 = arith.constant 0 : i32
    return %c0_i32, %c0_i32_0 : i32, i32
  }
  func.func @transform_2(%arg0: i32) -> (i32, i32) {
    %c0_i32 = arith.constant 0 : i32
    %c0_i32_0 = arith.constant 0 : i32
    %c0_i32_1 = arith.constant 0 : i32
    return %c0_i32, %c0_i32_0 : i32, i32
  }
  func.func @transform_3(%arg0: i32) -> (i32, i32) {
    %c0_i32 = arith.constant 0 : i32
    %c0_i32_0 = arith.constant 0 : i32
    %c0_i32_1 = arith.constant 0 : i32
    return %c0_i32, %c0_i32_0 : i32, i32
  }
  func.func @transform_4(%arg0: i32) -> (i32, i32) {
    %c0_i32 = arith.constant 0 : i32
    %c0_i32_0 = arith.constant 0 : i32
    %c0_i32_1 = arith.constant 0 : i32
    return %c0_i32, %c0_i32_0 : i32, i32
  }
  func.func @transform_5(%arg0: i32) -> (i32, i32) {
    %c0_i32 = arith.constant 0 : i32
    %c0_i32_0 = arith.constant 0 : i32
    %c0_i32_1 = arith.constant 0 : i32
    return %c0_i32, %c0_i32_0 : i32, i32
  }
  func.func @transform_6(%arg0: i32) -> (i32, i32) {
    %c0_i32 = arith.constant 0 : i32
    %c0_i32_0 = arith.constant 0 : i32
    return %c0_i32, %arg0 : i32, i32
  }
}

</mosaic_0001>

<bundles_post_ra>
// kernel: _net_forward_jit.1
= control target key start
LH: loop header
LB: loop body
LE: loop exit
PB: predicated region body
PF: predicated region fallthrough
CT: control target
= control target key end

     0   :  { %vm107_vm0 = vcmask 1043456   ;;  %vm82_vm1 = vcmask 64512   ;;  %v998_v1 = vmov 0   ;;  %vm396_vm2 = vcmask 523264   ;;  %s1246_s0 = inlined_call_operand.vmem [shape: f32[8,128], index: 0, kind: input, shape index: {}]   ;;  %s1247_s1 = inlined_call_operand.vmem [shape: bf16[128,8], index: 1, kind: input, shape index: {}]   ;;  %s1248_s2 = inlined_call_operand.vmem [shape: f32[64,1], index: 2, kind: input, shape index: {}]   ;;  %s1249_s4 = inlined_call_operand.vmem [shape: f32[128,1], index: 4, kind: input, shape index: {}]   ;;  %s1250_s3 = inlined_call_operand.vmem [shape: bf16[256,64], index: 3, kind: input, shape index: {}]   ;;  %s1251_s5 = inlined_call_operand.vmem [shape: bf16[1,128], index: 5, kind: input, shape index: {}]   ;;  %s1252_s6 = inlined_call_operand.vmem [shape: f32[1,128], index: 6, kind: output, shape index: {}]  }
   0x1   :  { %v24_v0 = vld [vmem:[%s1246_s0] sm:$0xff]  ;;  %972 = vset.pattern.permute.xlu0 %v998_v1  ;;  %973 = vset.pattern.permute.xlu1 %v998_v1  ;;  %v975_v5 = vld [vmem:[%s1247_s1 + $0x8] sm:$0xff]   ;;  %v976_v6 = vld [vmem:[%s1247_s1 + $0x10] sm:$0xff]   ;;  %vm1000_vm3 = vmmov 0  }
   0x2   :  { %v25_v2 = vpack.c.bf16 %v24_v0, %v24_v0  ;;  %v974_v3 = vld [vmem:[%s1247_s1] sm:$0xff]   ;;  %v218_v8 = vld [vmem:[%s1248_s2 + $0x10] sm:$0xff]  ;;  %v217_v9 = vld [vmem:[%s1248_s2 + $0x8] sm:$0xff] }
   0x3   :  { %892 = vmatprep.mubr.msk.bf16.mxu0 %vm82_vm1, %v974_v3  ;;  %v216_v7 = vld [vmem:[%s1248_s2] sm:$0xff]  ;;  %236 = vperm.xlu1 %973, %v218_v8   ;;  %v219_v10 = vld [vmem:[%s1248_s2 + $0x18] sm:$0xff]  ;;  %v221_v14 = vld [vmem:[%s1248_s2 + $0x28] sm:$0xff] }
   0x4   :  { %968 = vmatprep.subr.msk.bf16.mxu0 %vm107_vm0, %v25_v2  ;;  %v109_v4 = vsel %vm107_vm0, %v25_v2, 0  ;;  %226 = vperm.xlu0 %972, %v216_v7   ;;  %v977_v11 = vld [vmem:[%s1247_s1 + $0x18] sm:$0xff]   ;;  %v978_v12 = vld [vmem:[%s1247_s1 + $0x20] sm:$0xff]   ;;  %v222_v15 = vld [vmem:[%s1248_s2 + $0x30] sm:$0xff] }
   0x5   :  { %891 = vmatpush3.bf16.msra.mxu0 %v109_v4  ;;  %v220_v13 = vld [vmem:[%s1248_s2 + $0x20] sm:$0xff]  ;;  %v223_v16 = vld [vmem:[%s1248_s2 + $0x38] sm:$0xff]  ;;  %v979_v17 = vld [vmem:[%s1247_s1 + $0x28] sm:$0xff]  }
   0x6   :  { %v980_v18 = vld [vmem:[%s1247_s1 + $0x30] sm:$0xff]   ;;  %v622_v19 = vld [vmem:[%s1249_s4] sm:$0xff]  ;;  %v623_v20 = vld [vmem:[%s1249_s4 + $0x8] sm:$0xff] }
   0x7   :  { %241 = vperm.xlu1 %973, %v219_v10   ;;  %v624_v21 = vld [vmem:[%s1249_s4 + $0x10] sm:$0xff]  ;;  %v625_v22 = vld [vmem:[%s1249_s4 + $0x18] sm:$0xff]  ;;  %v626_v24 = vld [vmem:[%s1249_s4 + $0x20] sm:$0xff] }
   0x8   :  { %893 = vmatmul.mubr.msk.bf16.vlgmr.msra.gmra.mrb[0].mxu0 %vm82_vm1, %v975_v5  ;;  %231 = vperm.xlu0 %972, %v217_v9   ;;  %v981_v23 = vld [vmem:[%s1247_s1 + $0x38] sm:$0xff]   ;;  %v627_v25 = vld [vmem:[%s1249_s4 + $0x28] sm:$0xff]  ;;  %v628_v26 = vld [vmem:[%s1249_s4 + $0x30] sm:$0xff] }
   0x9   :  { %896 = vmatprep.mubr.msk.bf16.mxu0 %vm82_vm1, %v976_v6  ;;  %v629_v27 = vld [vmem:[%s1249_s4 + $0x38] sm:$0xff]  ;;  %v630_v28 = vld [vmem:[%s1249_s4 + $0x40] sm:$0xff]  ;;  %v631_v29 = vld [vmem:[%s1249_s4 + $0x48] sm:$0xff] }
   0xa   :  { %v632_v30 = vld [vmem:[%s1249_s4 + $0x50] sm:$0xff]  ;;  %v633_v31 = vld [vmem:[%s1249_s4 + $0x58] sm:$0xff]  ;;  %v634_v32 = vld [vmem:[%s1249_s4 + $0x60] sm:$0xff] }
   0xb   :  { %251 = vperm.xlu1 %973, %v221_v14   ;;  %v635_v33 = vld [vmem:[%s1249_s4 + $0x68] sm:$0xff]  ;;  %v636_v34 = vld [vmem:[%s1249_s4 + $0x70] sm:$0xff]  ;;  %v637_v35 = vld [vmem:[%s1249_s4 + $0x78] sm:$0xff] }
   0xc   :  { %246 = vperm.xlu0 %972, %v220_v13   ;;  %v982_v36 = vld [vmem:[%s1250_s3] sm:$0xff]  }
   0xd   :  { %916 = vmatprep.mubr.msk.bf16.mxu1 %vm396_vm2, %v982_v36  ;;  %v994_v36 = vld [vmem:[%s1250_s3 + $0x60] sm:$0xff]  }
   0xf   :  { %261 = vperm.xlu1 %973, %v223_v16  }
  0x10   :  { %897 = vmatmul.mubr.msk.bf16.gmra.mrb[4].mxu0 %vm82_vm1, %v977_v11  ;;  %256 = vperm.xlu0 %972, %v222_v15  }
  0x11   :  { %900 = vmatprep.mubr.msk.bf16.mxu0 %vm82_vm1, %v978_v12 }
  0x13   :  { %645 = vperm.xlu1 %973, %v623_v20  }
  0x14   :  { %640 = vperm.xlu0 %972, %v622_v19  }
  0x17   :  { %655 = vperm.xlu1 %973, %v625_v22  }
  0x18   :  { %901 = vmatmul.mubr.msk.bf16.gmra.mrb[8].mxu0 %vm82_vm1, %v979_v17  ;;  %650 = vperm.xlu0 %972, %v624_v21  }
  0x19   :  { %904 = vmatprep.mubr.msk.bf16.mxu0 %vm82_vm1, %v980_v18 }
  0x1b   :  { %665 = vperm.xlu1 %973, %v627_v25   ;;  %v983_v25 = vld [vmem:[%s1250_s3 + $0x8] sm:$0xff]  }
  0x1c   :  { %660 = vperm.xlu0 %972, %v626_v24  }
  0x1f   :  { %675 = vperm.xlu1 %973, %v629_v27   ;;  %v985_v27 = vld [vmem:[%s1250_s3 + $0x18] sm:$0xff]  }
  0x20   :  { %905 = vmatmul.mubr.msk.bf16.gmra.mrb[12].mxu0 %vm82_vm1, %v981_v23  ;;  %670 = vperm.xlu0 %972, %v628_v26   ;;  %v984_v26 = vld [vmem:[%s1250_s3 + $0x10] sm:$0xff]  }
  0x23   :  { %685 = vperm.xlu1 %973, %v631_v29   ;;  %v987_v29 = vld [vmem:[%s1250_s3 + $0x28] sm:$0xff]  }
  0x24   :  { %680 = vperm.xlu0 %972, %v630_v28   ;;  %v986_v28 = vld [vmem:[%s1250_s3 + $0x20] sm:$0xff]  }
  0x27   :  { %695 = vperm.xlu1 %973, %v633_v31   ;;  %v989_v31 = vld [vmem:[%s1250_s3 + $0x38] sm:$0xff]  }
  0x28   :  { %690 = vperm.xlu0 %972, %v632_v30   ;;  %v988_v30 = vld [vmem:[%s1250_s3 + $0x30] sm:$0xff]  }
  0x2b   :  { %705 = vperm.xlu1 %973, %v635_v33   ;;  %v991_v33 = vld [vmem:[%s1250_s3 + $0x48] sm:$0xff]  }
  0x2c   :  { %700 = vperm.xlu0 %972, %v634_v32   ;;  %v990_v32 = vld [vmem:[%s1250_s3 + $0x40] sm:$0xff]  }
  0x2f   :  { %715 = vperm.xlu1 %973, %v637_v35   ;;  %v993_v35 = vld [vmem:[%s1250_s3 + $0x58] sm:$0xff]  }
  0x30   :  { %710 = vperm.xlu0 %972, %v636_v34   ;;  %v992_v34 = vld [vmem:[%s1250_s3 + $0x50] sm:$0xff]  }
  0x82   :  { %v237_v44 = vpop.permute.xlu1 %236 }
  0x83   :  { %v227_v41 = vpop.permute.xlu0 %226 }
  0x86   :  { %v242_v48 = vpop.permute.xlu1 %241 }
  0x87   :  { %v232_v47 = vpop.permute.xlu0 %231 }
  0x8a   :  { %v252_v61 = vpop.permute.xlu1 %251 }
  0x8b   :  { %v247_v57 = vpop.permute.xlu0 %246 }
  0x8e   :  { %v262_v14 = vpop.permute.xlu1 %261 }
  0x8f   :  { %v257_v7 = vpop.permute.xlu0 %256 }
  0xdb   :  { %v894_v37 = vpop.f32.mrb[0].mxu0 }
  0xdc   :  { %v145_v38 = vpop.f32.mrb[1].mxu0 }
  0xdd   :  { %v895_v39 = vpop.f32.mrb[2].mxu0 }
  0xde   :  { %v148_v40 = vpop.f32.mrb[3].mxu0 }
  0xe3   :  { %v898_v42 = vpop.f32.mrb[4].mxu0 }
  0xe4   :  { %v161_v43 = vpop.f32.mrb[5].mxu0 }
  0xe5   :  { %v899_v45 = vpop.f32.mrb[6].mxu0 }
  0xe6   :  { %v164_v46 = vpop.f32.mrb[7].mxu0 }
  0xeb   :  { %v902_v49 = vpop.f32.mrb[8].mxu0 }
  0xec   :  { %v210_v50 = vmax.f32 %v894_v37, %v902_v49  ;;  %v177_v51 = vpop.f32.mrb[9].mxu0  ;;  %v995_v37 = vld [vmem:[%s1250_s3 + $0x68] sm:$0xff]   ;;  %v641_v49 = vpop.permute.xlu0 %640 }
  0xed   :  { %v208_v52 = vmax.f32 %v145_v38, %v177_v51  ;;  %v903_v53 = vpop.f32.mrb[10].mxu0  ;;  %v996_v38 = vld [vmem:[%s1250_s3 + $0x70] sm:$0xff]  }
  0xee   :  { %v266_v54 = vadd.f32 %v237_v44, %v210_v50  ;;  %v211_v55 = vmax.f32 %v895_v39, %v903_v53  ;;  %v180_v56 = vpop.f32.mrb[11].mxu0  ;;  %v997_v39 = vld [vmem:[%s1250_s3 + $0x78] sm:$0xff]  }
  0xef   :  { %v264_v58 = vadd.f32 %v227_v41, %v208_v52  ;;  %v209_v59 = vmax.f32 %v148_v40, %v180_v56  ;;  %v999_v40 = vmov 0.0   ;;  %v646_v52 = vpop.permute.xlu1 %645 }
  0xf0   :  { %v267_v60 = vadd.f32 %v242_v48, %v211_v55  ;;  %v274_v63 = vmax.f32 %v266_v54, 0.0  ;;  %948 = vmatprep.subr.bf16.mxu0 %v999_v40  ;;  %964 = vmatprep.mubr.msk.bf16.mxu0 %vm1000_vm3, %v999_v40  ;;  %v651_v55 = vpop.permute.xlu0 %650 }
  0xf1   :  { %v265_v62 = vadd.f32 %v232_v47, %v209_v59  ;;  %v272_v1 = vmax.f32 %v264_v58, 0.0 }
  0xf2   :  { %v275_v0 = vmax.f32 %v267_v60, 0.0 }
  0xf3   :  { %v273_v2 = vmax.f32 %v265_v62, 0.0  ;;  %v906_v3 = vpop.f32.mrb[12].mxu0  ;;  %v656_v56 = vpop.permute.xlu1 %655 }
  0xf4   :  { %v214_v4 = vmax.f32 %v898_v42, %v906_v3  ;;  %v193_v5 = vpop.f32.mrb[13].mxu0  ;;  %v313_v6 = vpack.c.bf16 %v275_v0, %v274_v63 }
  0xf5   :  { %v212_v8 = vmax.f32 %v161_v43, %v193_v5  ;;  %v907_v9 = vpop.f32.mrb[14].mxu0  ;;  %v312_v10 = vpack.c.bf16 %v273_v2, %v272_v1 }
  0xf6   :  { %v270_v11 = vadd.f32 %v257_v7, %v214_v4  ;;  %v215_v12 = vmax.f32 %v899_v45, %v907_v9  ;;  %v196_v13 = vpop.f32.mrb[15].mxu0 }
  0xf7   :  { %v268_v15 = vadd.f32 %v247_v57, %v212_v8  ;;  %v213_v16 = vmax.f32 %v164_v46, %v196_v13  ;;  %908 = vmatprep.subr.bf16.mxu1 %v312_v10  ;;  %v666_v62 = vpop.permute.xlu1 %665 }
  0xf8   :  { %v271_v17 = vadd.f32 %v262_v14, %v215_v12  ;;  %909 = vmatpush3.bf16.msra.mxu1 %v312_v10  ;;  %v278_v19 = vmax.f32 %v270_v11, 0.0 }
  0xf9   :  { %v269_v18 = vadd.f32 %v252_v61, %v213_v16  ;;  %910 = vmatprep.subr.bf16.mxu1 %v313_v6  ;;  %v276_v21 = vmax.f32 %v268_v15, 0.0  ;;  %v661_v61 = vpop.permute.xlu0 %660 }
  0xfa   :  { %v279_v20 = vmax.f32 %v271_v17, 0.0 }
  0xfb   :  { %v277_v22 = vmax.f32 %v269_v18, 0.0  ;;  %v676_v8 = vpop.permute.xlu1 %675 }
  0xfc   :  { %911 = vmatpush3.bf16.msra.mxu1 %v313_v6  ;;  %v315_v23 = vpack.c.bf16 %v279_v20, %v278_v19 }
  0xfd   :  { %v314_v24 = vpack.c.bf16 %v277_v22, %v276_v21  ;;  %v671_v2 = vpop.permute.xlu0 %670 }
  0xff   :  { %912 = vmatprep.subr.bf16.mxu1 %v314_v24  ;;  %v686_v22 = vpop.permute.xlu1 %685 }
 0x100   :  { %913 = vmatpush3.bf16.msra.mxu1 %v314_v24 }
 0x101   :  { %914 = vmatprep.subr.bf16.mxu1 %v315_v23  ;;  %v681_v15 = vpop.permute.xlu0 %680 }
 0x104   :  { %915 = vmatpush3.bf16.msra.mxu1 %v315_v23 }
 0x107   :  { %917 = vmatmul.mubr.msk.bf16.vlgmr.msra.gmra.mrb[0].mxu1 %vm396_vm2, %v983_v25 }
 0x108   :  { %920 = vmatprep.mubr.msk.bf16.mxu1 %vm396_vm2, %v984_v26 }
 0x10f   :  { %921 = vmatmul.mubr.msk.bf16.gmra.mrb[4].mxu1 %vm396_vm2, %v985_v27 }
 0x110   :  { %924 = vmatprep.mubr.msk.bf16.mxu1 %vm396_vm2, %v986_v28 }
 0x117   :  { %925 = vmatmul.mubr.msk.bf16.gmra.mrb[8].mxu1 %vm396_vm2, %v987_v29 }
 0x118   :  { %928 = vmatprep.mubr.msk.bf16.mxu1 %vm396_vm2, %v988_v30 }
 0x11f   :  { %929 = vmatmul.mubr.msk.bf16.gmra.mrb[12].mxu1 %vm396_vm2, %v989_v31 }
 0x120   :  { %932 = vmatprep.mubr.msk.bf16.mxu1 %vm396_vm2, %v990_v32  ;;  %v691_v32 = vpop.permute.xlu0 %690 }
 0x127   :  { %933 = vmatmul.mubr.msk.bf16.gmra.mrb[16].mxu1 %vm396_vm2, %v991_v33 }
 0x128   :  { %936 = vmatprep.mubr.msk.bf16.mxu1 %vm396_vm2, %v992_v34 }
 0x12f   :  { %937 = vmatmul.mubr.msk.bf16.gmra.mrb[20].mxu1 %vm396_vm2, %v993_v35 }
 0x130   :  { %940 = vmatprep.mubr.msk.bf16.mxu1 %vm396_vm2, %v994_v36  ;;  %v696_v36 = vpop.permute.xlu1 %695 }
 0x137   :  { %941 = vmatmul.mubr.msk.bf16.gmra.mrb[24].mxu1 %vm396_vm2, %v995_v37 }
 0x138   :  { %944 = vmatprep.mubr.msk.bf16.mxu1 %vm396_vm2, %v996_v38 }
 0x13f   :  { %945 = vmatmul.mubr.msk.bf16.gmra.mrb[28].mxu1 %vm396_vm2, %v997_v39 }
 0x1da   :  { %v918_v41 = vpop.f32.mrb[0].mxu1 }
 0x1db   :  { %v479_v42 = vpop.f32.mrb[1].mxu1 }
 0x1dc   :  { %v919_v43 = vpop.f32.mrb[2].mxu1 }
 0x1dd   :  { %v482_v44 = vpop.f32.mrb[3].mxu1 }
 0x1e2   :  { %v922_v45 = vpop.f32.mrb[4].mxu1 }
 0x1e3   :  { %v495_v46 = vpop.f32.mrb[5].mxu1 }
 0x1e4   :  { %v923_v47 = vpop.f32.mrb[6].mxu1 }
 0x1e5   :  { %v498_v48 = vpop.f32.mrb[7].mxu1 }
 0x1ea   :  { %v1209_v50 = vpop.f32.mrb[8].mxu1 }
 0x1eb   :  { %v1211_v51 = vpop.f32.mrb[9].mxu1 }
 0x1ec   :  { %v1213_v53 = vpop.f32.mrb[10].mxu1 }
 0x1ed   :  { %v1215_v54 = vpop.f32.mrb[11].mxu1 }
 0x1f2   :  { %v1217_v57 = vpop.f32.mrb[12].mxu1 }
 0x1f3   :  { %v1219_v58 = vpop.f32.mrb[13].mxu1 }
 0x1f4   :  { %v1221_v59 = vpop.f32.mrb[14].mxu1 }
 0x1f5   :  { %v1223_v60 = vpop.f32.mrb[15].mxu1 }
 0x1fa   :  { %v934_v63 = vpop.f32.mrb[16].mxu1 }
 0x1fb   :  { %v608_v0 = vmax.f32 %v918_v41, %v934_v63  ;;  %v543_v1 = vpop.f32.mrb[17].mxu1 }
 0x1fc   :  { %v606_v3 = vmax.f32 %v479_v42, %v543_v1  ;;  %v935_v4 = vpop.f32.mrb[18].mxu1 }
 0x1fd   :  { %v720_v5 = vadd.f32 %v651_v55, %v608_v0  ;;  %v609_v6 = vmax.f32 %v919_v43, %v935_v4  ;;  %v546_v7 = vpop.f32.mrb[19].mxu1 }
 0x1fe   :  { %v718_v9 = vadd.f32 %v641_v49, %v606_v3  ;;  %v607_v10 = vmax.f32 %v482_v44, %v546_v7 }
 0x1ff   :  { %v721_v11 = vadd.f32 %v656_v56, %v609_v6  ;;  %v736_v13 = vmax.f32 %v720_v5, 0.0 }
 0x200   :  { %v719_v12 = vadd.f32 %v646_v52, %v607_v10  ;;  %v734_v16 = vmax.f32 %v718_v9, 0.0  ;;  %v701_v52 = vpop.permute.xlu0 %700 }
 0x201   :  { %v737_v14 = vmax.f32 %v721_v11, 0.0 }
 0x202   :  { %v735_v17 = vmax.f32 %v719_v12, 0.0  ;;  %v938_v18 = vpop.f32.mrb[20].mxu1 }
 0x203   :  { %v752_v19 = vpack.c.bf16 %v737_v14, %v736_v13  ;;  %v612_v20 = vmax.f32 %v922_v45, %v938_v18  ;;  %v559_v21 = vpop.f32.mrb[21].mxu1 }
 0x204   :  { %v751_v23 = vpack.c.bf16 %v735_v17, %v734_v16  ;;  %v610_v24 = vmax.f32 %v495_v46, %v559_v21  ;;  %v939_v25 = vpop.f32.mrb[22].mxu1  ;;  %v711_v5 = vpop.permute.xlu0 %710 }
 0x205   :  { %v724_v26 = vadd.f32 %v671_v2, %v612_v20  ;;  %v613_v27 = vmax.f32 %v923_v47, %v939_v25  ;;  %v562_v28 = vpop.f32.mrb[23].mxu1 }
 0x206   :  { %v722_v29 = vadd.f32 %v661_v61, %v610_v24  ;;  %v611_v30 = vmax.f32 %v498_v48, %v562_v28  ;;  %949 = vmatpush3.bf16.msra.mxu0 %v751_v23 }
 0x207   :  { %v725_v31 = vadd.f32 %v676_v8, %v613_v27  ;;  %950 = vmatprep.subr.bf16.mxu0 %v999_v40  ;;  %v740_v34 = vmax.f32 %v724_v26, 0.0 }
 0x208   :  { %v723_v33 = vadd.f32 %v666_v62, %v611_v30  ;;  %v738_v37 = vmax.f32 %v722_v29, 0.0 }
 0x209   :  { %v741_v35 = vmax.f32 %v725_v31, 0.0 }
 0x20a   :  { %v739_v38 = vmax.f32 %v723_v33, 0.0  ;;  %v942_v39 = vpop.f32.mrb[24].mxu1  ;;  %951 = vmatpush3.bf16.msra.mxu0 %v752_v19 }
 0x20b   :  { %v754_v41 = vpack.c.bf16 %v741_v35, %v740_v34  ;;  %v616_v42 = vmax.f32 %v1209_v50, %v942_v39  ;;  %v575_v43 = vpop.f32.mrb[25].mxu1  ;;  %952 = vmatprep.subr.bf16.mxu0 %v999_v40  ;;  %v706_v50 = vpop.permute.xlu1 %705 }
 0x20c   :  { %v753_v44 = vpack.c.bf16 %v739_v38, %v738_v37  ;;  %v614_v45 = vmax.f32 %v1211_v51, %v575_v43  ;;  %v943_v46 = vpop.f32.mrb[26].mxu1 }
 0x20d   :  { %v728_v47 = vadd.f32 %v691_v32, %v616_v42  ;;  %v617_v48 = vmax.f32 %v1213_v53, %v943_v46  ;;  %v578_v49 = vpop.f32.mrb[27].mxu1 }
 0x20e   :  { %v726_v55 = vadd.f32 %v681_v15, %v614_v45  ;;  %v615_v56 = vmax.f32 %v1215_v54, %v578_v49  ;;  %953 = vmatpush3.bf16.msra.mxu0 %v753_v44 }
 0x20f   :  { %v729_v61 = vadd.f32 %v696_v36, %v617_v48  ;;  %954 = vmatprep.subr.bf16.mxu0 %v999_v40  ;;  %v744_v63 = vmax.f32 %v728_v47, 0.0  ;;  %v716_v11 = vpop.permute.xlu1 %715 }
 0x210   :  { %v727_v62 = vadd.f32 %v686_v22, %v615_v56  ;;  %v742_v1 = vmax.f32 %v726_v55, 0.0 }
 0x211   :  { %v745_v0 = vmax.f32 %v729_v61, 0.0 }
 0x212   :  { %v743_v2 = vmax.f32 %v727_v62, 0.0  ;;  %v946_v51 = vpop.f32.mrb[28].mxu1  ;;  %955 = vmatpush3.bf16.msra.mxu0 %v754_v41 }
 0x213   :  { %v756_v3 = vpack.c.bf16 %v745_v0, %v744_v63  ;;  %v620_v53 = vmax.f32 %v1217_v57, %v946_v51  ;;  %v591_v4 = vpop.f32.mrb[29].mxu1  ;;  %956 = vmatprep.subr.bf16.mxu0 %v999_v40 }
 0x214   :  { %v755_v54 = vpack.c.bf16 %v743_v2, %v742_v1  ;;  %v618_v6 = vmax.f32 %v1219_v58, %v591_v4  ;;  %v947_v7 = vpop.f32.mrb[30].mxu1 }
 0x215   :  { %v732_v8 = vadd.f32 %v711_v5, %v620_v53  ;;  %v621_v9 = vmax.f32 %v1221_v59, %v947_v7  ;;  %v594_v10 = vpop.f32.mrb[31].mxu1  ;;  %v750_v59 = vld [vmem:[%s1251_s5] sm:$0x1] }
 0x216   :  { %v730_v12 = vadd.f32 %v701_v52, %v618_v6  ;;  %v619_v13 = vmax.f32 %v1223_v60, %v594_v10  ;;  %957 = vmatpush3.bf16.msra.mxu0 %v755_v54 }
 0x217   :  { %v733_v14 = vadd.f32 %v716_v11, %v621_v9  ;;  %958 = vmatprep.subr.bf16.mxu0 %v999_v40  ;;  %v748_v15 = vmax.f32 %v732_v8, 0.0 }
 0x218   :  { %v731_v57 = vadd.f32 %v706_v50, %v619_v13  ;;  %v746_v17 = vmax.f32 %v730_v12, 0.0 }
 0x219   :  { %v749_v16 = vmax.f32 %v733_v14, 0.0 }
 0x21a   :  { %v747_v18 = vmax.f32 %v731_v57, 0.0  ;;  %959 = vmatpush3.bf16.msra.mxu0 %v756_v3 }
 0x21b   :  { %v758_v58 = vpack.c.bf16 %v749_v16, %v748_v15  ;;  %960 = vmatprep.subr.bf16.mxu0 %v999_v40 }
 0x21c   :  { %v757_v19 = vpack.c.bf16 %v747_v18, %v746_v17 }
 0x21e   :  { %961 = vmatpush3.bf16.msra.mxu0 %v757_v19 }
 0x21f   :  { %962 = vmatprep.subr.bf16.mxu0 %v999_v40 }
 0x222   :  { %963 = vmatpush3.bf16.msra.mxu0 %v758_v58 }
 0x225   :  { %965 = vmatmul.mubr.bf16.vlgmr.msra.gmra.mrb[16].mxu0 %v750_v59 }
 0x2f8   :  { %v793_v60 = vpop.f32.mrb[16].mxu0 }
 0x2f9   :  { %799 = vst [vmem:[%s1252_s6] sm:$0x1] %v793_v60  ;;  %v966_v20 = vpop.f32.mrb[17].mxu0 }
 0x2fa   :  { %v796_v21 = vpop.f32.mrb[18].mxu0 }
 0x2fb   :  { %v967_v22 = vpop.f32.mrb[19].mxu0 }

</bundles_post_ra>
